<compile_context>
chip_gen: v6e
topology: v6e:2x2x1
jax: 0.10.0
libtpu: 0.0.40
codegen_flags: <defaults>
</compile_context>

<pallas_src>
import functools

import jax
import jax.numpy as jnp
from jax.experimental import pallas as pl
from jax.experimental.pallas import tpu as pltpu


def attention_kernel(x_ref, gamma_ref, beta_ref, wqkv_ref, wo_ref, bo_ref,
                     o_ref, *, heads: int, eps: float):
    # One batch element per grid step; kernel view of x is (1, N, D).
    x = x_ref[0]                                     # (N, D), input dtype
    N, D = x.shape
    mxu_dtype = wqkv_ref.dtype                       # MXU operands follow the param dtype

    # ---- LayerNorm (f32 statistics; PyTorch default eps=1e-5, elementwise affine) ----
    xf = x.astype(jnp.float32)
    mean = jnp.mean(xf, axis=-1, keepdims=True)
    cent = xf - mean
    var = jnp.mean(cent * cent, axis=-1, keepdims=True)
    xn = cent * jax.lax.rsqrt(var + eps)
    xn = xn * gamma_ref[0].astype(jnp.float32) + beta_ref[0].astype(jnp.float32)
    xn = xn.astype(mxu_dtype)                        # (N, D)

    # ---- Q/K/V projections, head-major, one batched MXU contraction each ----
    # Stacked weight: (3, heads, D, dh); leading-axis picks are layout-free (no lane
    # slicing).  Wq already carries the softmax scale (folded wrapper-side).
    w_all = wqkv_ref[...]                            # (3, H, D, dh)
    wq, wk, wv = w_all[0], w_all[1], w_all[2]        # each (H, D, dh)

    xb = jnp.broadcast_to(xn[None, :, :], (heads, N, D))             # (H, N, D)
    q = jnp.einsum('hnd,hdk->hnk', xb, wq,
                   preferred_element_type=jnp.float32)               # (H, N, dh)
    k = jnp.einsum('hnd,hdk->hnk', xb, wk,
                   preferred_element_type=jnp.float32)               # (H, N, dh)
    v = jnp.einsum('hnd,hdk->hnk', xb, wv,
                   preferred_element_type=jnp.float32)               # (H, N, dh)

    # ---- Scaled dot-product attention, batched over heads (softmax in f32) ----
    s = jnp.einsum('hnd,hmd->hnm', q.astype(mxu_dtype), k.astype(mxu_dtype),
                   preferred_element_type=jnp.float32)               # (H, N, N)
    s = s - jnp.max(s, axis=-1, keepdims=True)
    p = jnp.exp(s)
    p = p * pl.reciprocal(jnp.sum(p, axis=-1, keepdims=True), approx=True)

    o = jnp.einsum('hnm,hmd->hnd', p.astype(mxu_dtype), v.astype(mxu_dtype),
                   preferred_element_type=jnp.float32)               # (H, N, dh)

    # ---- Fused head-merge + output projection (no concatenate, no back-transpose):
    #      y = sum_h (o_h @ Wo_h) + b   with Wo pre-split into (heads, dh, D). ----
    yh = jnp.einsum('hnd,hdk->hnk', o.astype(mxu_dtype), wo_ref[...],
                    preferred_element_type=jnp.float32)              # (H, N, D)
    y = jnp.sum(yh, axis=0) + bo_ref[0].astype(jnp.float32)          # (N, D)

    # Dropout(p=0.0) is the identity.
    o_ref[0] = y.astype(o_ref.dtype)


def attention_forward(x, gamma, beta, wqkv, wo, bo, *, heads: int):
    """x: (B, N, D); wqkv: (D, 3D) (in,out); wo: (D, D) (in,out); gamma/beta/bo: (1, D)."""
    B, N, D = x.shape
    dh = D // heads
    scale = float(dh) ** -0.5

    # Wrapper-side weight rearrangement (one-time, plain XLA; no in-kernel relayouts):
    #   Wq gets the softmax scale baked in; Wq/Wk/Wv -> stacked (3, heads, D, dh);
    #   Wo -> (heads, dh, D).
    wq3 = (wqkv[:, 0 * D:1 * D] * jnp.asarray(scale, wqkv.dtype)) \
        .reshape(D, heads, dh).transpose(1, 0, 2)
    wk3 = wqkv[:, 1 * D:2 * D].reshape(D, heads, dh).transpose(1, 0, 2)
    wv3 = wqkv[:, 2 * D:3 * D].reshape(D, heads, dh).transpose(1, 0, 2)
    wqkv3 = jnp.stack([wq3, wk3, wv3], axis=0)       # (3, H, D, dh)
    wo3 = wo.reshape(heads, dh, D)

    kernel = functools.partial(attention_kernel, heads=heads, eps=1e-5)
    return pl.pallas_call(
        kernel,
        out_shape=jax.ShapeDtypeStruct((B, N, D), x.dtype),
        grid_spec=pltpu.PrefetchScalarGridSpec(
            num_scalar_prefetch=0,
            grid=(B,),
            in_specs=[
                pl.BlockSpec((1, N, D), lambda b: (b, 0, 0)),              # x
                pl.BlockSpec((1, D), lambda b: (0, 0)),                    # ln gamma
                pl.BlockSpec((1, D), lambda b: (0, 0)),                    # ln beta
                pl.BlockSpec((3, heads, D, dh), lambda b: (0, 0, 0, 0)),   # Wq/Wk/Wv stacked
                pl.BlockSpec((heads, dh, D), lambda b: (0, 0, 0)),         # Wo, head-major
                pl.BlockSpec((1, D), lambda b: (0, 0)),                    # bo
            ],
            out_specs=pl.BlockSpec((1, N, D), lambda b: (b, 0, 0)),
        ),
        compiler_params=pltpu.CompilerParams(dimension_semantics=("parallel",)),
    )(x, gamma, beta, wqkv3, wo3, bo)


def attention_reference(x, gamma, beta, wqkv, wo, bo, *, heads: int):
    B, N, D = x.shape
    d = D // heads
    mean = jnp.mean(x, axis=-1, keepdims=True)
    var = jnp.mean((x - mean) ** 2, axis=-1, keepdims=True)
    xn = (x - mean) / jnp.sqrt(var + 1e-5) * gamma[0] + beta[0]
    qkv = xn @ wqkv
    q, k, v = jnp.split(qkv, 3, axis=-1)

    def split_heads(t):
        return t.reshape(B, N, heads, d).transpose(0, 2, 1, 3)

    q, k, v = map(split_heads, (q, k, v))
    dots = jnp.einsum("bhnd,bhmd->bhnm", q, k) * (d ** -0.5)
    attn = jax.nn.softmax(dots, axis=-1)
    out = jnp.einsum("bhnm,bhmd->bhnd", attn, v)
    out = out.transpose(0, 2, 1, 3).reshape(B, N, D)
    return out @ wo + bo[0]


if __name__ == "__main__":
    B, N, D, HEADS = 2, 8, 32, 8          # dim=32, heads=8 -> dim_head=4

    key = jax.random.PRNGKey(0)
    kx, kqkv, kwo, kbo = jax.random.split(key, 4)

    x = jax.random.normal(kx, (B, N, D), dtype=jnp.float32)
    gamma = jnp.ones((1, D), dtype=jnp.float32)           # LayerNorm weight init
    beta = jnp.zeros((1, D), dtype=jnp.float32)           # LayerNorm bias init
    wqkv = jax.random.normal(kqkv, (D, 3 * D), dtype=jnp.float32) * (D ** -0.5)
    wo = jax.random.normal(kwo, (D, D), dtype=jnp.float32) * (D ** -0.5)
    bo = jax.random.normal(kbo, (1, D), dtype=jnp.float32) * 0.02

    out = attention_forward(x, gamma, beta, wqkv, wo, bo, heads=HEADS)
    out = jax.block_until_ready(out)

    ref = attention_reference(x, gamma, beta, wqkv, wo, bo, heads=HEADS)
    assert out.shape == (B, N, D)
    # Tolerance accounts for the EUP approximate reciprocal in the softmax denominator.
    assert jnp.allclose(out, ref, atol=5e-3, rtol=5e-3), "mismatch vs reference"

    print("KERNEL_OK")
</pallas_src>

<mosaic_0001>
module attributes {stable_mosaic.version = 11 : i64} {
  func.func @attention_kernel(%arg0: i32, %arg1: memref<1x8x32xf32, #tpu.memory_space<vmem>>, %arg2: memref<1x32xf32, #tpu.memory_space<vmem>>, %arg3: memref<1x32xf32, #tpu.memory_space<vmem>>, %arg4: memref<3x8x32x4xf32, #tpu.memory_space<vmem>>, %arg5: memref<8x4x32xf32, #tpu.memory_space<vmem>>, %arg6: memref<1x32xf32, #tpu.memory_space<vmem>>, %arg7: memref<1x8x32xf32, #tpu.memory_space<vmem>>) attributes {dimension_semantics = [#tpu.dimension_semantics<parallel>], iteration_bounds = array<i64: 2>, scalar_prefetch = 0 : i64, scratch_operands = 0 : i64, tpu.core_type = #tpu.core_type<tc>, window_params = [{transform_indices = @transform_0, window_bounds = array<i64: 1, 8, 32>}, {pipeline_mode = #tpu.pipeline_mode<synchronous>, transform_indices = @transform_1, window_bounds = array<i64: 1, 32>}, {pipeline_mode = #tpu.pipeline_mode<synchronous>, transform_indices = @transform_2, window_bounds = array<i64: 1, 32>}, {pipeline_mode = #tpu.pipeline_mode<synchronous>, transform_indices = @transform_3, window_bounds = array<i64: 3, 8, 32, 4>}, {pipeline_mode = #tpu.pipeline_mode<synchronous>, transform_indices = @transform_4, window_bounds = array<i64: 8, 4, 32>}, {pipeline_mode = #tpu.pipeline_mode<synchronous>, transform_indices = @transform_5, window_bounds = array<i64: 1, 32>}, {transform_indices = @transform_6, window_bounds = array<i64: 1, 8, 32>}]} {
    %c0 = arith.constant 0 : index
    %c0_0 = arith.constant 0 : index
    %c0_1 = arith.constant 0 : index
    %0 = vector.load %arg1[%c0, %c0_0, %c0_1] : memref<1x8x32xf32, #tpu.memory_space<vmem>>, vector<1x8x32xf32>
    %1 = vector.shape_cast %0 : vector<1x8x32xf32> to vector<8x32xf32>
    %cst = arith.constant dense<0.000000e+00> : vector<8xf32>
    %2 = vector.multi_reduction <add>, %1, %cst [1] : vector<8x32xf32> to vector<8xf32>
    %3 = vector.shape_cast %2 : vector<8xf32> to vector<8x1xf32>
    %cst_2 = arith.constant 3.200000e+01 : f32
    %4 = vector.broadcast %cst_2 : f32 to vector<8x1xf32>
    %5 = arith.divf %3, %4 : vector<8x1xf32>
    %6 = vector.broadcast %5 : vector<8x1xf32> to vector<8x32xf32>
    %7 = arith.subf %1, %6 : vector<8x32xf32>
    %8 = arith.mulf %7, %7 : vector<8x32xf32>
    %cst_3 = arith.constant dense<0.000000e+00> : vector<8xf32>
    %9 = vector.multi_reduction <add>, %8, %cst_3 [1] : vector<8x32xf32> to vector<8xf32>
    %10 = vector.shape_cast %9 : vector<8xf32> to vector<8x1xf32>
    %cst_4 = arith.constant 3.200000e+01 : f32
    %11 = vector.broadcast %cst_4 : f32 to vector<8x1xf32>
    %12 = arith.divf %10, %11 : vector<8x1xf32>
    %cst_5 = arith.constant 9.99999974E-6 : f32
    %13 = vector.broadcast %cst_5 : f32 to vector<8x1xf32>
    %14 = arith.addf %12, %13 : vector<8x1xf32>
    %15 = math.rsqrt %14 : vector<8x1xf32>
    %16 = vector.broadcast %15 : vector<8x1xf32> to vector<8x32xf32>
    %17 = arith.mulf %7, %16 : vector<8x32xf32>
    %c0_6 = arith.constant 0 : index
    %c0_7 = arith.constant 0 : index
    %18 = vector.load %arg2[%c0_6, %c0_7] : memref<1x32xf32, #tpu.memory_space<vmem>>, vector<1x32xf32>
    %19 = vector.shape_cast %18 : vector<1x32xf32> to vector<32xf32>
    %20 = vector.shape_cast %19 : vector<32xf32> to vector<1x32xf32>
    %21 = vector.broadcast %20 : vector<1x32xf32> to vector<8x32xf32>
    %22 = arith.mulf %17, %21 : vector<8x32xf32>
    %c0_8 = arith.constant 0 : index
    %c0_9 = arith.constant 0 : index
    %23 = vector.load %arg3[%c0_8, %c0_9] : memref<1x32xf32, #tpu.memory_space<vmem>>, vector<1x32xf32>
    %24 = vector.shape_cast %23 : vector<1x32xf32> to vector<32xf32>
    %25 = vector.shape_cast %24 : vector<32xf32> to vector<1x32xf32>
    %26 = vector.broadcast %25 : vector<1x32xf32> to vector<8x32xf32>
    %27 = arith.addf %22, %26 : vector<8x32xf32>
    %c0_10 = arith.constant 0 : index
    %c0_11 = arith.constant 0 : index
    %c0_12 = arith.constant 0 : index
    %c0_13 = arith.constant 0 : index
    %28 = vector.load %arg4[%c0_10, %c0_11, %c0_12, %c0_13] : memref<3x8x32x4xf32, #tpu.memory_space<vmem>>, vector<3x8x32x4xf32>
    %29 = vector.extract_strided_slice %28 {offsets = [0, 0, 0, 0], sizes = [1, 8, 32, 4], strides = [1, 1, 1, 1]} : vector<3x8x32x4xf32> to vector<1x8x32x4xf32>
    %30 = vector.shape_cast %29 : vector<1x8x32x4xf32> to vector<8x32x4xf32>
    %31 = vector.extract_strided_slice %28 {offsets = [1, 0, 0, 0], sizes = [1, 8, 32, 4], strides = [1, 1, 1, 1]} : vector<3x8x32x4xf32> to vector<1x8x32x4xf32>
    %32 = vector.shape_cast %31 : vector<1x8x32x4xf32> to vector<8x32x4xf32>
    %33 = vector.extract_strided_slice %28 {offsets = [2, 0, 0, 0], sizes = [1, 8, 32, 4], strides = [1, 1, 1, 1]} : vector<3x8x32x4xf32> to vector<1x8x32x4xf32>
    %34 = vector.shape_cast %33 : vector<1x8x32x4xf32> to vector<8x32x4xf32>
    %35 = vector.shape_cast %27 : vector<8x32xf32> to vector<1x8x32xf32>
    %36 = vector.shape_cast %35 : vector<1x8x32xf32> to vector<1x8x32xf32>
    %37 = vector.broadcast %36 : vector<1x8x32xf32> to vector<8x8x32xf32>
    "tpu.trace_start"() <{level = 10 : i32, message = "hnd,hdk->hnk"}> : () -> ()
    %cst_14 = arith.constant dense<0.000000e+00> : vector<8x8x4xf32>
    %38 = tpu.matmul %37, %30, %cst_14 {dimension_numbers = #tpu.dot_dimension_numbers<[2], [1], [1], [2], [0, 0, 0, 1, 1, 2], [0], [0]>} : vector<8x8x32xf32>, vector<8x32x4xf32>, vector<8x8x4xf32> -> vector<8x8x4xf32>
    %cst_15 = arith.constant dense<0.000000e+00> : vector<8x8x4xf32>
    %39 = tpu.matmul %37, %32, %cst_15 {dimension_numbers = #tpu.dot_dimension_numbers<[2], [1], [1], [2], [0, 0, 0, 1, 1, 2], [0], [0]>} : vector<8x8x32xf32>, vector<8x32x4xf32>, vector<8x8x4xf32> -> vector<8x8x4xf32>
    %cst_16 = arith.constant dense<0.000000e+00> : vector<8x8x4xf32>
    %40 = tpu.matmul %37, %34, %cst_16 {dimension_numbers = #tpu.dot_dimension_numbers<[2], [1], [1], [2], [0, 0, 0, 1, 1, 2], [0], [0]>} : vector<8x8x32xf32>, vector<8x32x4xf32>, vector<8x8x4xf32> -> vector<8x8x4xf32>
    "tpu.trace_stop"() : () -> ()
    "tpu.trace_start"() <{level = 10 : i32, message = "hnd,hmd->hnm"}> : () -> ()
    %cst_17 = arith.constant dense<0.000000e+00> : vector<8x8x8xf32>
    %41 = tpu.matmul %38, %39, %cst_17 {dimension_numbers = #tpu.dot_dimension_numbers<[2], [2], [1], [1], [0, 0, 0, 1, 1, 1], [0], [0]>} : vector<8x8x4xf32>, vector<8x8x4xf32>, vector<8x8x8xf32> -> vector<8x8x8xf32>
    "tpu.trace_stop"() : () -> ()
    %cst_18 = arith.constant dense<0xFF800000> : vector<8x8xf32>
    %42 = vector.multi_reduction <maximumf>, %41, %cst_18 [2] : vector<8x8x8xf32> to vector<8x8xf32>
    %43 = vector.shape_cast %42 : vector<8x8xf32> to vector<8x8x1xf32>
    %44 = vector.broadcast %43 : vector<8x8x1xf32> to vector<8x8x8xf32>
    %45 = arith.subf %41, %44 : vector<8x8x8xf32>
    %46 = math.exp %45 : vector<8x8x8xf32>
    %cst_19 = arith.constant dense<0.000000e+00> : vector<8x8xf32>
    %47 = vector.multi_reduction <add>, %46, %cst_19 [2] : vector<8x8x8xf32> to vector<8x8xf32>
    %48 = vector.shape_cast %47 : vector<8x8xf32> to vector<8x8x1xf32>
    %49 = tpu.reciprocal %48 {approx = true} : vector<8x8x1xf32> -> vector<8x8x1xf32>
    %50 = vector.broadcast %49 : vector<8x8x1xf32> to vector<8x8x8xf32>
    %51 = arith.mulf %46, %50 : vector<8x8x8xf32>
    "tpu.trace_start"() <{level = 10 : i32, message = "hnm,hmd->hnd"}> : () -> ()
    %cst_20 = arith.constant dense<0.000000e+00> : vector<8x8x4xf32>
    %52 = tpu.matmul %51, %40, %cst_20 {dimension_numbers = #tpu.dot_dimension_numbers<[2], [1], [1], [2], [0, 0, 0, 1, 1, 2], [0], [0]>} : vector<8x8x8xf32>, vector<8x8x4xf32>, vector<8x8x4xf32> -> vector<8x8x4xf32>
    "tpu.trace_stop"() : () -> ()
    %c0_21 = arith.constant 0 : index
    %c0_22 = arith.constant 0 : index
    %c0_23 = arith.constant 0 : index
    %53 = vector.load %arg5[%c0_21, %c0_22, %c0_23] : memref<8x4x32xf32, #tpu.memory_space<vmem>>, vector<8x4x32xf32>
    "tpu.trace_start"() <{level = 10 : i32, message = "hnd,hdk->hnk"}> : () -> ()
    %cst_24 = arith.constant dense<0.000000e+00> : vector<8x8x32xf32>
    %54 = tpu.matmul %52, %53, %cst_24 {dimension_numbers = #tpu.dot_dimension_numbers<[2], [1], [1], [2], [0, 0, 0, 1, 1, 2], [0], [0]>} : vector<8x8x4xf32>, vector<8x4x32xf32>, vector<8x8x32xf32> -> vector<8x8x32xf32>
    "tpu.trace_stop"() : () -> ()
    %cst_25 = arith.constant dense<0.000000e+00> : vector<8x32xf32>
    %55 = vector.multi_reduction <add>, %54, %cst_25 [0] : vector<8x8x32xf32> to vector<8x32xf32>
    %c0_26 = arith.constant 0 : index
    %c0_27 = arith.constant 0 : index
    %56 = vector.load %arg6[%c0_26, %c0_27] : memref<1x32xf32, #tpu.memory_space<vmem>>, vector<1x32xf32>
    %57 = vector.shape_cast %56 : vector<1x32xf32> to vector<32xf32>
    %58 = vector.shape_cast %57 : vector<32xf32> to vector<1x32xf32>
    %59 = vector.broadcast %58 : vector<1x32xf32> to vector<8x32xf32>
    %60 = arith.addf %55, %59 : vector<8x32xf32>
    %c0_28 = arith.constant 0 : index
    %c0_29 = arith.constant 0 : index
    %c0_30 = arith.constant 0 : index
    %61 = vector.load %arg7[%c0_28, %c0_29, %c0_30] : memref<1x8x32xf32, #tpu.memory_space<vmem>>, vector<1x8x32xf32>
    %62 = vector.shape_cast %61 : vector<1x8x32xf32> to vector<8x32xf32>
    %63 = vector.shape_cast %60 : vector<8x32xf32> to vector<1x8x32xf32>
    tpu.vector_store %arg7[%c0_28, %c0_29, %c0_30], %63 {strides = array<i32>} : memref<1x8x32xf32, #tpu.memory_space<vmem>>, vector<1x8x32xf32>,
    return
  }
  func.func @transform_0(%arg0: i32) -> (i32, i32, i32) {
    %c0_i32 = arith.constant 0 : i32
    %c0_i32_0 = arith.constant 0 : i32
    %c0_i32_1 = arith.constant 0 : i32
    return %arg0, %c0_i32, %c0_i32_0 : i32, i32, i32
  }
  func.func @transform_1(%arg0: i32) -> (i32, i32) {
    %c0_i32 = arith.constant 0 : i32
    %c0_i32_0 = arith.constant 0 : i32
    %c0_i32_1 = arith.constant 0 : i32
    return %c0_i32, %c0_i32_0 : i32, i32
  }
  func.func @transform_2(%arg0: i32) -> (i32, i32) {
    %c0_i32 = arith.constant 0 : i32
    %c0_i32_0 = arith.constant 0 : i32
    %c0_i32_1 = arith.constant 0 : i32
    return %c0_i32, %c0_i32_0 : i32, i32
  }
  func.func @transform_3(%arg0: i32) -> (i32, i32, i32, i32) {
    %c0_i32 = arith.constant 0 : i32
    %c0_i32_0 = arith.constant 0 : i32
    %c0_i32_1 = arith.constant 0 : i32
    %c0_i32_2 = arith.constant 0 : i32
    %c0_i32_3 = arith.constant 0 : i32
    return %c0_i32, %c0_i32_0, %c0_i32_1, %c0_i32_2 : i32, i32, i32, i32
  }
  func.func @transform_4(%arg0: i32) -> (i32, i32, i32) {
    %c0_i32 = arith.constant 0 : i32
    %c0_i32_0 = arith.constant 0 : i32
    %c0_i32_1 = arith.constant 0 : i32
    %c0_i32_2 = arith.constant 0 : i32
    return %c0_i32, %c0_i32_0, %c0_i32_1 : i32, i32, i32
  }
  func.func @transform_5(%arg0: i32) -> (i32, i32) {
    %c0_i32 = arith.constant 0 : i32
    %c0_i32_0 = arith.constant 0 : i32
    %c0_i32_1 = arith.constant 0 : i32
    return %c0_i32, %c0_i32_0 : i32, i32
  }
  func.func @transform_6(%arg0: i32) -> (i32, i32, i32) {
    %c0_i32 = arith.constant 0 : i32
    %c0_i32_0 = arith.constant 0 : i32
    %c0_i32_1 = arith.constant 0 : i32
    return %arg0, %c0_i32, %c0_i32_0 : i32, i32, i32
  }
}

</mosaic_0001>

<bundles_post_ra>
// kernel: tpu_custom_call.1
= control target key start
LH: loop header
LB: loop body
LE: loop exit
PB: predicated region body
PF: predicated region fallthrough
CT: control target
= control target key end

     0   :  { %11 = vsyncpa [#allocation3], 0  ;;  %s5617_s0 = inlined_call_operand.vmem [shape: f32[2,8,32], index: 0, kind: input, shape index: {}]   ;;  %s5618_s1 = inlined_call_operand.vmem [shape: f32[1,32], index: 1, kind: input, shape index: {}]   ;;  %s5619_s2 = inlined_call_operand.vmem [shape: f32[1,32], index: 2, kind: input, shape index: {}]   ;;  %s5620_s3 = inlined_call_operand.vmem [shape: f32[3,8,32,4], index: 3, kind: input, shape index: {}]   ;;  %s5621_s4 = inlined_call_operand.vmem [shape: f32[8,4,32], index: 4, kind: input, shape index: {}]   ;;  %s5622_s5 = inlined_call_operand.vmem [shape: f32[1,32], index: 5, kind: input, shape index: {}]   ;;  %s5623_s6 = inlined_call_operand.hbm [shape: f32[2,8,32], index: 6, kind: output, shape index: {}]  }
   0x1   :  { %13 = vsyncpa [#allocation3 + $0x1], 0  ;;  %s4858_s21 = smov 0   ;;  %s4860_s22 = smov 0  }
   0x2   :  { %s4862_s23 = smov 0   ;;  %s4864_s24 = smov 0  }
   0x3 LB: > { %s4879_s25 = sadd.s32 4294967295, %s4818_s24   ;;  %s4054_s26 = sadd.s32 4294967294, %s4818_s24   ;;  %s4818_s24 = sphi %s4864_s24, %s5629_s24   ;;  %s4814_s23 = sphi %s4862_s23, %s5628_s23   ;;  %s4810_s22 = sphi %s4860_s22, %s5627_s22   ;;  %s4806_s21 = sphi %s4858_s21, %s5626_s21  }
   0x4   : > { %s4883_s27 = sadd.s32 1, %s4818_s24   ;;  %s157_s28 = sadd.s32 1, %s4814_s23 }
   0x5   : > { %s154_s29 = ssub.s32 %s4818_s24, %s4883_s27  ;;  %p167_p0 = scmp.ne.s32.totalorder %s4814_s23, %s4810_s22 }
   0x6   : > { %p155_p1 = scmp.eq.s32.totalorder %s154_s29, 0  ;;  %p168_p2 = scmp.eq.s32.totalorder %s4879_s25, 1 }
   0x7   : > { %p173_p3 = scmp.ne.s32.totalorder %s4810_s22, %s4806_s21  ;;  %p174_p4 = scmp.eq.s32.totalorder %s4054_s26, 1 }
   0x8   : > { %s4894_s30 = scalar_select %p155_p1, %s4814_s23, %s157_s28  }
   0x9   : > { %p4896_p5 = por %p168_p2, %p167_p0  ;;  %p4900_p6 = por %p174_p4, %p173_p3 }
   0xa   : > { %p4057_p7 = scmp.ge.s32.totalorder %s4818_s24, 1  ;;  %p214_p8 = scmp.lt.s32.totalorder %s4818_s24, 3 }
   0xc   : > { %p215_p9 = pnand %p4057_p7, %p214_p8 }
   0xd   : > { %p243_p10 = scmp.lt.s32.totalorder (!%p215_p9), %s4879_s25, 1  ;;  %s240_s16 = sand.u32 (!%p215_p9), 1, %s4810_s22  }
   0xe   : > { %218 = sbr.rel (%p215_p9) target bundleno = 1509 (0x5e5), region = 44  ;;  %s4058_s17 = sshll.u32 (!%p215_p9), %s240_s16, 3 }
   0xf   : > { %s4128_s20 = sshll.u32 (!%p215_p9), %s4879_s25, 7  ;;  %s242_s26 = scalar_lea.vmem (!%p215_p9), [#allocation2], %s4058_s17 }
  0x10   : > { %s3995_s28 = sshll.u32 (!%p215_p9), %s242_s26, 4  ;;  %s3982_s11 = scalar_lea.sflag (!%p215_p9), [#allocation3], %s240_s16  ;;  %s3996_s28 = int_to_ptr.vmem [resolvable:$true] %s3995_s28 }
  0x11   : > { %s4758_s12 = scalar_lea.vmem (!%p215_p9), %s3996_s28, 128 }
  0x12   : > { %p4759_p11 = scmp.ne.s32.totalorder (!%p215_p9), %s3996_s28, %s4758_s12 }
  0x13   : > { %s244_s9 = scalar_select %p243_p10, %s4879_s25, 1  ;;  %vm248_vm0 = vcmask 261120   ;;  %v4820_v7 = vmov 0.0   ;;  %v282_v8 = vld [vmem:[%s5620_s3 + $0x18] sm:$0xff]  ;;  %v281_v10 = vld [vmem:[%s5620_s3 + $0x10] sm:$0xff]  ;;  %v280_v12 = vld [vmem:[%s5620_s3 + $0x8] sm:$0xff] }
  0x14   : > { %4299 = vmatprep.subr.mxu0 %v4820_v7  ;;  %4310 = vmatprep.subr.mxu1 %v4820_v7  ;;  %v286_v9 = vld [vmem:[%s5620_s3 + $0x38] sm:$0xff]  ;;  %v285_v11 = vld [vmem:[%s5620_s3 + $0x30] sm:$0xff]  ;;  %v284_v13 = vld [vmem:[%s5620_s3 + $0x28] sm:$0xff]  ;;  %vm4821_vm1 = vmmov 0   ;;  %vm2058_vm2 = vcmask 31744   ;;  %vm2667_vm3 = vcmask 64512   ;;  %p4760_p12 = pnand %p4759_p11, %p4896_p5 }
  0x15   : > { %s4059_s10 = sshll.u32 %s244_s9, 3  ;;  %4300 = vmatpush3.msra.mxu0 %v282_v8  ;;  %4311 = vmatpush3.msra.mxu1 %v286_v9  ;;  %v279_v14 = vld [vmem:[%s5620_s3] sm:$0xff]  ;;  %v290_v25 = vld [vmem:[%s5620_s3 + $0x58] sm:$0xff]  ;;  %v289_v27 = vld [vmem:[%s5620_s3 + $0x50] sm:$0xff]  ;;  %vm3351_vm4 = vcmask 1043456  }
  0x16   : > { %s246_s13 = scalar_lea.vmem %s5617_s0, %s4059_s10  ;;  %4301 = vmatprep.subr.mxu0 %v4820_v7  ;;  %4312 = vmatprep.subr.mxu1 %v4820_v7  ;;  %v283_v15 = vld [vmem:[%s5620_s3 + $0x20] sm:$0xff]  ;;  %v294_v26 = vld [vmem:[%s5620_s3 + $0x78] sm:$0xff]  ;;  %v293_v28 = vld [vmem:[%s5620_s3 + $0x70] sm:$0xff]  ;;  %s3993_s10 = scalar_lea.hbm %s5623_s6, %s4128_s20 }
  0x17   : > { %v247_v0 = vld [vmem:[%s246_s13] sm:$0xff]  ;;  %4302 = vmatpush3.msra.mxu0 %v281_v10  ;;  %4313 = vmatpush3.msra.mxu1 %v285_v11  ;;  %v288_v29 = vld [vmem:[%s5620_s3 + $0x48] sm:$0xff]  ;;  %v298_v33 = vld [vmem:[%s5620_s3 + $0x98] sm:$0xff]  ;;  %p4761_p13 = pneg %p4760_p12  ;;  %s4822_s13 = smov [#allocation2]  }
  0x18   : > { %v249_v1 = vsel %vm248_vm0, %v247_v0, 0.0  ;;  %4303 = vmatprep.subr.mxu0 %v4820_v7  ;;  %4314 = vmatprep.subr.mxu1 %v4820_v7  ;;  %v4060_v20 = vld [vmem:[%s5618_s1] ss:$0 sm:$0xff]  ;;  %v292_v30 = vld [vmem:[%s5620_s3 + $0x68] sm:$0xff]  ;;  %v302_v34 = vld [vmem:[%s5620_s3 + $0xb8] sm:$0xff]  ;;  %s4762_s14 = sshll.u32 %s4822_s13, 4  ;;  %s4763_s14 = int_to_ptr.vmem [resolvable:$false] %s4762_s14 }
  0x19   : > { %250 = vadd.xlane.f32.xlu0 %v249_v1  ;;  %4304 = vmatpush3.msra.mxu0 %v280_v12  ;;  %v4061_v22 = vld [vmem:[%s5619_s2] ss:$0 sm:$0xff]  ;;  %v297_v35 = vld [vmem:[%s5620_s3 + $0x90] sm:$0xff]  ;;  %v296_v37 = vld [vmem:[%s5620_s3 + $0x88] sm:$0xff]  ;;  %s4764_s25 = scalar_lea.vmem %s4763_s14, 256  ;;  %p4765_p0 = scmp.lt.s32.totalorder %s3996_s28, %s4763_s14 }
  0x1a   : > { %4315 = vmatpush3.msra.mxu1 %v284_v13  ;;  %4305 = vmatprep.subr.mxu0 %v4820_v7  ;;  %v287_v31 = vld [vmem:[%s5620_s3 + $0x40] sm:$0xff]  ;;  %v301_v36 = vld [vmem:[%s5620_s3 + $0xb0] sm:$0xff]  ;;  %v300_v38 = vld [vmem:[%s5620_s3 + $0xa8] sm:$0xff]  ;;  %p4766_p1 = scmp.lt.s32.totalorder %s4764_s25, %s4758_s12 }
  0x1b   : > { %4316 = vmatprep.subr.mxu1 %v4820_v7  ;;  %4306 = vmatpush3.msra.mxu0 %v279_v14  ;;  %v291_v32 = vld [vmem:[%s5620_s3 + $0x60] sm:$0xff]  ;;  %v306_v41 = vld [vmem:[%s5620_s3 + $0xd8] sm:$0xff]  ;;  %v305_v43 = vld [vmem:[%s5620_s3 + $0xd0] sm:$0xff] }
  0x1c   : > { %4317 = vmatpush3.msra.mxu1 %v283_v15  ;;  %4307 = vmatprep.mubr.msk.f32.mxu0 %vm4821_vm1, %v4820_v7  ;;  %v295_v39 = vld [vmem:[%s5620_s3 + $0x80] sm:$0xff]  ;;  %v310_v42 = vld [vmem:[%s5620_s3 + $0xf8] sm:$0xff]  ;;  %v309_v44 = vld [vmem:[%s5620_s3 + $0xf0] sm:$0xff]  ;;  %p4767_p2 = por %p4766_p1, %p4765_p0 }
  0x1d   : > { %4318 = vmatprep.mubr.msk.f32.mxu1 %vm4821_vm1, %v4820_v7  ;;  %4321 = vmatprep.subr.mxu0 %v4820_v7  ;;  %v299_v40 = vld [vmem:[%s5620_s3 + $0xa0] sm:$0xff]  ;;  %v304_v45 = vld [vmem:[%s5620_s3 + $0xc8] sm:$0xff]  ;;  %v314_v49 = vld [vmem:[%s5620_s3 + $0x118] sm:$0xff] }
  0x1e   : > { %4332 = vmatprep.subr.mxu1 %v4820_v7  ;;  %v308_v46 = vld [vmem:[%s5620_s3 + $0xe8] sm:$0xff]  ;;  %v303_v47 = vld [vmem:[%s5620_s3 + $0xc0] sm:$0xff]  ;;  %v318_v50 = vld [vmem:[%s5620_s3 + $0x138] sm:$0xff]  ;;  %p4768_p3 = pnand %p4767_p2, %p4761_p13 }
  0x1f   : > { %v307_v48 = vld [vmem:[%s5620_s3 + $0xe0] sm:$0xff]  ;;  %v313_v51 = vld [vmem:[%s5620_s3 + $0x110] sm:$0xff]  ;;  %v312_v53 = vld [vmem:[%s5620_s3 + $0x108] sm:$0xff] }
  0x20   : > { %v317_v52 = vld [vmem:[%s5620_s3 + $0x130] sm:$0xff]  ;;  %v316_v54 = vld [vmem:[%s5620_s3 + $0x128] sm:$0xff]  ;;  %v311_v55 = vld [vmem:[%s5620_s3 + $0x100] sm:$0xff] }
  0x21   : > { %v315_v56 = vld [vmem:[%s5620_s3 + $0x120] sm:$0xff]  ;;  %v322_v57 = vld [vmem:[%s5620_s3 + $0x158] sm:$0xff]  ;;  %v321_v59 = vld [vmem:[%s5620_s3 + $0x150] sm:$0xff] }
  0x22   : > { %v326_v58 = vld [vmem:[%s5620_s3 + $0x178] sm:$0xff]  ;;  %v325_v60 = vld [vmem:[%s5620_s3 + $0x170] sm:$0xff]  ;;  %v320_v61 = vld [vmem:[%s5620_s3 + $0x148] sm:$0xff] }
  0x23   : > { %v324_v62 = vld [vmem:[%s5620_s3 + $0x168] sm:$0xff]  ;;  %v319_v63 = vld [vmem:[%s5620_s3 + $0x140] sm:$0xff]  ;;  %v330_v1 = vld [vmem:[%s5620_s3 + $0x198] sm:$0xff] }
  0x24   : > { %v327_v8 = vld [vmem:[%s5620_s3 + $0x180] sm:$0xff]  ;;  %v338_v10 = vld [vmem:[%s5620_s3 + $0x1d8] sm:$0xff]  ;;  %v337_v12 = vld [vmem:[%s5620_s3 + $0x1d0] sm:$0xff] }
  0x25   : > { %v331_v9 = vld [vmem:[%s5620_s3 + $0x1a0] sm:$0xff]  ;;  %v342_v11 = vld [vmem:[%s5620_s3 + $0x1f8] sm:$0xff]  ;;  %v341_v13 = vld [vmem:[%s5620_s3 + $0x1f0] sm:$0xff] }
  0x26   : > { %v336_v14 = vld [vmem:[%s5620_s3 + $0x1c8] sm:$0xff] }
  0x27   : > { %v340_v15 = vld [vmem:[%s5620_s3 + $0x1e8] sm:$0xff] }
  0xa2   : > { %v251_v2 = vpop.xlane.xlu0 %250 }
  0xa3   : > { %v253_v3 = vmul.f32 0.03125, %v251_v2  ;;  %v334_v2 = vld [vmem:[%s5620_s3 + $0x1b8] sm:$0xff] }
  0xa5   : > { %v254_v4 = vsub.f32 %v247_v0, %v253_v3  ;;  %v323_v0 = vld [vmem:[%s5620_s3 + $0x160] sm:$0xff]  ;;  %v329_v3 = vld [vmem:[%s5620_s3 + $0x190] sm:$0xff] }
  0xa7   : > { %v255_v5 = vmul.f32 %v254_v4, %v254_v4 }
  0xa9   : > { %v256_v6 = vsel %vm248_vm0, %v255_v5, 0.0  ;;  %v328_v5 = vld [vmem:[%s5620_s3 + $0x188] sm:$0xff] }
  0xaa   : > { %257 = vadd.xlane.f32.xlu0 %v256_v6  ;;  %v332_v6 = vld [vmem:[%s5620_s3 + $0x1a8] sm:$0xff] }
 0x133   : > { %v258_v16 = vpop.xlane.xlu0 %257 }
 0x134   : > { %v259_v17 = vmul.f32 0.03125, %v258_v16  ;;  %v335_v16 = vld [vmem:[%s5620_s3 + $0x1c0] sm:$0xff] }
 0x136   : > { %v260_v18 = vadd.f32 1e-05, %v259_v17  ;;  %v339_v17 = vld [vmem:[%s5620_s3 + $0x1e0] sm:$0xff] }
 0x138   : > { %4724 = vrsqrt.f32 %v260_v18  ;;  %v346_v18 = vld [vmem:[%s5620_s3 + $0x218] sm:$0xff] }
 0x145   : > { %v4725_v19 = vpop.eup %4724 }
 0x146   : > { %v262_v21 = vmul.f32 %v4725_v19, %v254_v4  ;;  %v333_v4 = vld [vmem:[%s5620_s3 + $0x1b0] sm:$0xff]  ;;  %v350_v19 = vld [vmem:[%s5620_s3 + $0x238] sm:$0xff] }
 0x148   : > { %v270_v23 = vmul.f32 %v4060_v20, %v262_v21  ;;  %v345_v20 = vld [vmem:[%s5620_s3 + $0x210] sm:$0xff] }
 0x149   : > { %v349_v21 = vld [vmem:[%s5620_s3 + $0x230] sm:$0xff] }
 0x14a   : > { %v4957_v24 = vadd.f32 %v4061_v22, %v270_v23  ;;  %v344_v22 = vld [vmem:[%s5620_s3 + $0x208] sm:$0xff] }
 0x14b   : > { %v348_v23 = vld [vmem:[%s5620_s3 + $0x228] sm:$0xff] }
 0x14c   : > { %4308 = vmatmul.mubr.msk.f32.vlgmr.msra.gmra.mxu0 %vm248_vm0, %v4957_v24  ;;  %4319 = vmatmul.mubr.msk.f32.vlgmr.msra.gmra.mxu1 %vm248_vm0, %v4957_v24 }
 0x14d   : > { %4322 = vmatpush3.msra.mxu0 %v290_v25  ;;  %4333 = vmatpush3.msra.mxu1 %v294_v26  ;;  %v343_v25 = vld [vmem:[%s5620_s3 + $0x200] sm:$0xff] }
 0x14e   : > { %4323 = vmatprep.subr.mxu0 %v4820_v7  ;;  %4334 = vmatprep.subr.mxu1 %v4820_v7  ;;  %v347_v26 = vld [vmem:[%s5620_s3 + $0x220] sm:$0xff] }
 0x14f   : > { %4324 = vmatpush3.msra.mxu0 %v289_v27  ;;  %4335 = vmatpush3.msra.mxu1 %v293_v28  ;;  %v354_v27 = vld [vmem:[%s5620_s3 + $0x258] sm:$0xff] }
 0x150   : > { %4325 = vmatprep.subr.mxu0 %v4820_v7  ;;  %4336 = vmatprep.subr.mxu1 %v4820_v7  ;;  %v358_v28 = vld [vmem:[%s5620_s3 + $0x278] sm:$0xff] }
 0x151   : > { %4326 = vmatpush3.msra.mxu0 %v288_v29  ;;  %4337 = vmatpush3.msra.mxu1 %v292_v30  ;;  %v353_v29 = vld [vmem:[%s5620_s3 + $0x250] sm:$0xff] }
 0x152   : > { %4327 = vmatprep.subr.mxu0 %v4820_v7  ;;  %4338 = vmatprep.subr.mxu1 %v4820_v7  ;;  %v357_v30 = vld [vmem:[%s5620_s3 + $0x270] sm:$0xff] }
 0x153   : > { %4328 = vmatpush3.msra.mxu0 %v287_v31  ;;  %4329 = vmatprep.mubr.msk.f32.mxu0 %vm4821_vm1, %v4820_v7  ;;  %v352_v31 = vld [vmem:[%s5620_s3 + $0x248] sm:$0xff] }
 0x154   : > { %4339 = vmatpush3.msra.mxu1 %v291_v32  ;;  %4340 = vmatprep.mubr.msk.f32.mxu1 %vm4821_vm1, %v4820_v7  ;;  %v356_v32 = vld [vmem:[%s5620_s3 + $0x268] sm:$0xff] }
 0x155   : > { %4330 = vmatmul.mubr.msk.f32.vlgmr.msra.gmra.mxu0 %vm248_vm0, %v4957_v24  ;;  %4341 = vmatmul.mubr.msk.f32.vlgmr.msra.gmra.mxu1 %vm248_vm0, %v4957_v24 }
 0x156   : > { %4343 = vmatprep.subr.mxu0 %v4820_v7  ;;  %4354 = vmatprep.subr.mxu1 %v4820_v7 }
 0x157   : > { %4344 = vmatpush3.msra.mxu0 %v298_v33  ;;  %4355 = vmatpush3.msra.mxu1 %v302_v34  ;;  %v351_v33 = vld [vmem:[%s5620_s3 + $0x240] sm:$0xff] }
 0x158   : > { %4345 = vmatprep.subr.mxu0 %v4820_v7  ;;  %4356 = vmatprep.subr.mxu1 %v4820_v7  ;;  %v355_v34 = vld [vmem:[%s5620_s3 + $0x260] sm:$0xff] }
 0x159   : > { %4346 = vmatpush3.msra.mxu0 %v297_v35  ;;  %4357 = vmatpush3.msra.mxu1 %v301_v36  ;;  %v362_v35 = vld [vmem:[%s5620_s3 + $0x298] sm:$0xff] }
 0x15a   : > { %4347 = vmatprep.subr.mxu0 %v4820_v7  ;;  %4358 = vmatprep.subr.mxu1 %v4820_v7  ;;  %v366_v36 = vld [vmem:[%s5620_s3 + $0x2b8] sm:$0xff] }
 0x15b   : > { %4348 = vmatpush3.msra.mxu0 %v296_v37  ;;  %4359 = vmatpush3.msra.mxu1 %v300_v38  ;;  %v361_v37 = vld [vmem:[%s5620_s3 + $0x290] sm:$0xff] }
 0x15c   : > { %4349 = vmatprep.subr.mxu0 %v4820_v7  ;;  %4360 = vmatprep.subr.mxu1 %v4820_v7  ;;  %v365_v38 = vld [vmem:[%s5620_s3 + $0x2b0] sm:$0xff] }
 0x15d   : > { %4350 = vmatpush3.msra.mxu0 %v295_v39  ;;  %4351 = vmatprep.mubr.msk.f32.mxu0 %vm4821_vm1, %v4820_v7  ;;  %v360_v39 = vld [vmem:[%s5620_s3 + $0x288] sm:$0xff] }
 0x15e   : > { %4361 = vmatpush3.msra.mxu1 %v299_v40  ;;  %4362 = vmatprep.mubr.msk.f32.mxu1 %vm4821_vm1, %v4820_v7  ;;  %v364_v40 = vld [vmem:[%s5620_s3 + $0x2a8] sm:$0xff] }
 0x15f   : > { %4352 = vmatmul.mubr.msk.f32.vlgmr.msra.gmra.mxu0 %vm248_vm0, %v4957_v24  ;;  %4363 = vmatmul.mubr.msk.f32.vlgmr.msra.gmra.mxu1 %vm248_vm0, %v4957_v24 }
 0x160   : > { %4365 = vmatprep.subr.mxu0 %v4820_v7  ;;  %4376 = vmatprep.subr.mxu1 %v4820_v7 }
 0x161   : > { %4366 = vmatpush3.msra.mxu0 %v306_v41  ;;  %4377 = vmatpush3.msra.mxu1 %v310_v42  ;;  %v359_v41 = vld [vmem:[%s5620_s3 + $0x280] sm:$0xff] }
 0x162   : > { %4367 = vmatprep.subr.mxu0 %v4820_v7  ;;  %4378 = vmatprep.subr.mxu1 %v4820_v7  ;;  %v363_v42 = vld [vmem:[%s5620_s3 + $0x2a0] sm:$0xff] }
 0x163   : > { %4368 = vmatpush3.msra.mxu0 %v305_v43  ;;  %4379 = vmatpush3.msra.mxu1 %v309_v44  ;;  %v370_v43 = vld [vmem:[%s5620_s3 + $0x2d8] sm:$0xff] }
 0x164   : > { %4369 = vmatprep.subr.mxu0 %v4820_v7  ;;  %4380 = vmatprep.subr.mxu1 %v4820_v7  ;;  %v374_v44 = vld [vmem:[%s5620_s3 + $0x2f8] sm:$0xff] }
 0x165   : > { %4370 = vmatpush3.msra.mxu0 %v304_v45  ;;  %4381 = vmatpush3.msra.mxu1 %v308_v46  ;;  %v369_v45 = vld [vmem:[%s5620_s3 + $0x2d0] sm:$0xff] }
 0x166   : > { %4371 = vmatprep.subr.mxu0 %v4820_v7  ;;  %4382 = vmatprep.subr.mxu1 %v4820_v7  ;;  %v373_v46 = vld [vmem:[%s5620_s3 + $0x2f0] sm:$0xff] }
 0x167   : > { %4372 = vmatpush3.msra.mxu0 %v303_v47  ;;  %4373 = vmatprep.mubr.msk.f32.mxu0 %vm4821_vm1, %v4820_v7  ;;  %v368_v47 = vld [vmem:[%s5620_s3 + $0x2c8] sm:$0xff] }
 0x168   : > { %4383 = vmatpush3.msra.mxu1 %v307_v48  ;;  %4384 = vmatprep.mubr.msk.f32.mxu1 %vm4821_vm1, %v4820_v7  ;;  %v372_v48 = vld [vmem:[%s5620_s3 + $0x2e8] sm:$0xff] }
 0x169   : > { %4374 = vmatmul.mubr.msk.f32.vlgmr.msra.gmra.mxu0 %vm248_vm0, %v4957_v24  ;;  %4385 = vmatmul.mubr.msk.f32.vlgmr.msra.gmra.mxu1 %vm248_vm0, %v4957_v24 }
 0x16a   : > { %4387 = vmatprep.subr.mxu0 %v4820_v7  ;;  %4398 = vmatprep.subr.mxu1 %v4820_v7 }
 0x16b   : > { %4388 = vmatpush3.msra.mxu0 %v314_v49  ;;  %4399 = vmatpush3.msra.mxu1 %v318_v50  ;;  %v367_v49 = vld [vmem:[%s5620_s3 + $0x2c0] sm:$0xff] }
 0x16c   : > { %4389 = vmatprep.subr.mxu0 %v4820_v7  ;;  %4400 = vmatprep.subr.mxu1 %v4820_v7  ;;  %v371_v50 = vld [vmem:[%s5620_s3 + $0x2e0] sm:$0xff] }
 0x16d   : > { %4390 = vmatpush3.msra.mxu0 %v313_v51  ;;  %4401 = vmatpush3.msra.mxu1 %v317_v52 }
 0x16e   : > { %4391 = vmatprep.subr.mxu0 %v4820_v7  ;;  %4402 = vmatprep.subr.mxu1 %v4820_v7 }
 0x16f   : > { %4392 = vmatpush3.msra.mxu0 %v312_v53  ;;  %4403 = vmatpush3.msra.mxu1 %v316_v54 }
 0x170   : > { %4393 = vmatprep.subr.mxu0 %v4820_v7  ;;  %4404 = vmatprep.subr.mxu1 %v4820_v7 }
 0x171   : > { %4394 = vmatpush3.msra.mxu0 %v311_v55  ;;  %4395 = vmatprep.mubr.msk.f32.mxu0 %vm4821_vm1, %v4820_v7 }
 0x172   : > { %4405 = vmatpush3.msra.mxu1 %v315_v56  ;;  %4406 = vmatprep.mubr.msk.f32.mxu1 %vm4821_vm1, %v4820_v7 }
 0x173   : > { %4396 = vmatmul.mubr.msk.f32.vlgmr.msra.gmra.mxu0 %vm248_vm0, %v4957_v24  ;;  %4407 = vmatmul.mubr.msk.f32.vlgmr.msra.gmra.mxu1 %vm248_vm0, %v4957_v24 }
 0x174   : > { %4409 = vmatprep.subr.mxu0 %v4820_v7  ;;  %4420 = vmatprep.subr.mxu1 %v4820_v7 }
 0x175   : > { %4410 = vmatpush3.msra.mxu0 %v322_v57  ;;  %4421 = vmatpush3.msra.mxu1 %v326_v58 }
 0x176   : > { %4411 = vmatprep.subr.mxu0 %v4820_v7  ;;  %4422 = vmatprep.subr.mxu1 %v4820_v7 }
 0x177   : > { %4412 = vmatpush3.msra.mxu0 %v321_v59  ;;  %4423 = vmatpush3.msra.mxu1 %v325_v60 }
 0x178   : > { %4413 = vmatprep.subr.mxu0 %v4820_v7  ;;  %4424 = vmatprep.subr.mxu1 %v4820_v7 }
 0x179   : > { %4414 = vmatpush3.msra.mxu0 %v320_v61  ;;  %4425 = vmatpush3.msra.mxu1 %v324_v62 }
 0x17a   : > { %4415 = vmatprep.subr.mxu0 %v4820_v7  ;;  %4426 = vmatprep.subr.mxu1 %v4820_v7 }
 0x17b   : > { %4416 = vmatpush3.msra.mxu0 %v319_v63  ;;  %4417 = vmatprep.mubr.msk.f32.mxu0 %vm4821_vm1, %v4820_v7 }
 0x17c   : > { %4427 = vmatpush3.msra.mxu1 %v323_v0  ;;  %4428 = vmatprep.mubr.msk.f32.mxu1 %vm4821_vm1, %v4820_v7 }
 0x17d   : > { %4418 = vmatmul.mubr.msk.f32.vlgmr.msra.gmra.mxu0 %vm248_vm0, %v4957_v24  ;;  %4429 = vmatmul.mubr.msk.f32.vlgmr.msra.gmra.mxu1 %vm248_vm0, %v4957_v24 }
 0x17e   : > { %4431 = vmatprep.subr.mxu0 %v4820_v7  ;;  %4442 = vmatprep.subr.mxu1 %v4820_v7 }
 0x17f   : > { %4432 = vmatpush3.msra.mxu0 %v330_v1  ;;  %4443 = vmatpush3.msra.mxu1 %v334_v2 }
 0x180   : > { %4433 = vmatprep.subr.mxu0 %v4820_v7  ;;  %4444 = vmatprep.subr.mxu1 %v4820_v7 }
 0x181   : > { %4434 = vmatpush3.msra.mxu0 %v329_v3  ;;  %4445 = vmatpush3.msra.mxu1 %v333_v4 }
 0x182   : > { %4435 = vmatprep.subr.mxu0 %v4820_v7  ;;  %4446 = vmatprep.subr.mxu1 %v4820_v7 }
 0x183   : > { %4436 = vmatpush3.msra.mxu0 %v328_v5  ;;  %4447 = vmatpush3.msra.mxu1 %v332_v6 }
 0x184   : > { %4437 = vmatprep.subr.mxu0 %v4820_v7  ;;  %4448 = vmatprep.subr.mxu1 %v4820_v7 }
 0x185   : > { %4438 = vmatpush3.msra.mxu0 %v327_v8  ;;  %4439 = vmatprep.mubr.msk.f32.mxu0 %vm4821_vm1, %v4820_v7 }
 0x186   : > { %4449 = vmatpush3.msra.mxu1 %v331_v9  ;;  %4450 = vmatprep.mubr.msk.f32.mxu1 %vm4821_vm1, %v4820_v7 }
 0x187   : > { %4440 = vmatmul.mubr.msk.f32.vlgmr.msra.gmra.mxu0 %vm248_vm0, %v4957_v24  ;;  %4451 = vmatmul.mubr.msk.f32.vlgmr.msra.gmra.mxu1 %vm248_vm0, %v4957_v24 }
 0x188   : > { %4453 = vmatprep.subr.mxu0 %v4820_v7  ;;  %4464 = vmatprep.subr.mxu1 %v4820_v7 }
 0x189   : > { %4454 = vmatpush3.msra.mxu0 %v338_v10  ;;  %4465 = vmatpush3.msra.mxu1 %v342_v11 }
 0x18a   : > { %4455 = vmatprep.subr.mxu0 %v4820_v7  ;;  %4466 = vmatprep.subr.mxu1 %v4820_v7 }
 0x18b   : > { %4456 = vmatpush3.msra.mxu0 %v337_v12  ;;  %4467 = vmatpush3.msra.mxu1 %v341_v13 }
 0x18c   : > { %4457 = vmatprep.subr.mxu0 %v4820_v7  ;;  %4468 = vmatprep.subr.mxu1 %v4820_v7 }
 0x18d   : > { %4458 = vmatpush3.msra.mxu0 %v336_v14  ;;  %4469 = vmatpush3.msra.mxu1 %v340_v15 }
 0x18e   : > { %4459 = vmatprep.subr.mxu0 %v4820_v7  ;;  %4470 = vmatprep.subr.mxu1 %v4820_v7 }
 0x18f   : > { %4460 = vmatpush3.msra.mxu0 %v335_v16  ;;  %4461 = vmatprep.mubr.msk.f32.mxu0 %vm4821_vm1, %v4820_v7 }
 0x190   : > { %4471 = vmatpush3.msra.mxu1 %v339_v17  ;;  %4472 = vmatprep.mubr.msk.f32.mxu1 %vm4821_vm1, %v4820_v7 }
 0x191   : > { %4462 = vmatmul.mubr.msk.f32.vlgmr.msra.gmra.mxu0 %vm248_vm0, %v4957_v24  ;;  %4473 = vmatmul.mubr.msk.f32.vlgmr.msra.gmra.mxu1 %vm248_vm0, %v4957_v24 }
 0x192   : > { %4475 = vmatprep.subr.mxu0 %v4820_v7  ;;  %4486 = vmatprep.subr.mxu1 %v4820_v7 }
 0x193   : > { %4476 = vmatpush3.msra.mxu0 %v346_v18  ;;  %4487 = vmatpush3.msra.mxu1 %v350_v19 }
 0x194   : > { %4477 = vmatprep.subr.mxu0 %v4820_v7  ;;  %4488 = vmatprep.subr.mxu1 %v4820_v7 }
 0x195   : > { %4478 = vmatpush3.msra.mxu0 %v345_v20  ;;  %4489 = vmatpush3.msra.mxu1 %v349_v21 }
 0x196   : > { %4479 = vmatprep.subr.mxu0 %v4820_v7  ;;  %4490 = vmatprep.subr.mxu1 %v4820_v7 }
 0x197   : > { %4480 = vmatpush3.msra.mxu0 %v344_v22  ;;  %4491 = vmatpush3.msra.mxu1 %v348_v23 }
 0x198   : > { %4481 = vmatprep.subr.mxu0 %v4820_v7  ;;  %4492 = vmatprep.subr.mxu1 %v4820_v7 }
 0x199   : > { %4482 = vmatpush3.msra.mxu0 %v343_v25  ;;  %4483 = vmatprep.mubr.msk.f32.mxu0 %vm4821_vm1, %v4820_v7 }
 0x19a   : > { %4493 = vmatpush3.msra.mxu1 %v347_v26  ;;  %4494 = vmatprep.mubr.msk.f32.mxu1 %vm4821_vm1, %v4820_v7 }
 0x19b   : > { %4484 = vmatmul.mubr.msk.f32.vlgmr.msra.gmra.mxu0 %vm248_vm0, %v4957_v24  ;;  %4495 = vmatmul.mubr.msk.f32.vlgmr.msra.gmra.mxu1 %vm248_vm0, %v4957_v24 }
 0x19c   : > { %4497 = vmatprep.subr.mxu0 %v4820_v7  ;;  %4508 = vmatprep.subr.mxu1 %v4820_v7 }
 0x19d   : > { %4498 = vmatpush3.msra.mxu0 %v354_v27  ;;  %4509 = vmatpush3.msra.mxu1 %v358_v28 }
 0x19e   : > { %4499 = vmatprep.subr.mxu0 %v4820_v7  ;;  %4510 = vmatprep.subr.mxu1 %v4820_v7 }
 0x19f   : > { %4500 = vmatpush3.msra.mxu0 %v353_v29  ;;  %4511 = vmatpush3.msra.mxu1 %v357_v30 }
 0x1a0   : > { %4501 = vmatprep.subr.mxu0 %v4820_v7  ;;  %4512 = vmatprep.subr.mxu1 %v4820_v7 }
 0x1a1   : > { %4502 = vmatpush3.msra.mxu0 %v352_v31  ;;  %4513 = vmatpush3.msra.mxu1 %v356_v32 }
 0x1a2   : > { %4503 = vmatprep.subr.mxu0 %v4820_v7  ;;  %4514 = vmatprep.subr.mxu1 %v4820_v7 }
 0x1a3   : > { %4504 = vmatpush3.msra.mxu0 %v351_v33  ;;  %4505 = vmatprep.mubr.msk.f32.mxu0 %vm4821_vm1, %v4820_v7 }
 0x1a4   : > { %4515 = vmatpush3.msra.mxu1 %v355_v34  ;;  %4516 = vmatprep.mubr.msk.f32.mxu1 %vm4821_vm1, %v4820_v7 }
 0x1a5   : > { %4506 = vmatmul.mubr.msk.f32.vlgmr.msra.gmra.mxu0 %vm248_vm0, %v4957_v24  ;;  %4517 = vmatmul.mubr.msk.f32.vlgmr.msra.gmra.mxu1 %vm248_vm0, %v4957_v24 }
 0x1a6   : > { %4519 = vmatprep.subr.mxu0 %v4820_v7  ;;  %4530 = vmatprep.subr.mxu1 %v4820_v7 }
 0x1a7   : > { %4520 = vmatpush3.msra.mxu0 %v362_v35  ;;  %4531 = vmatpush3.msra.mxu1 %v366_v36 }
 0x1a8   : > { %4521 = vmatprep.subr.mxu0 %v4820_v7  ;;  %4532 = vmatprep.subr.mxu1 %v4820_v7 }
 0x1a9   : > { %4522 = vmatpush3.msra.mxu0 %v361_v37  ;;  %4533 = vmatpush3.msra.mxu1 %v365_v38 }
 0x1aa   : > { %4523 = vmatprep.subr.mxu0 %v4820_v7  ;;  %4534 = vmatprep.subr.mxu1 %v4820_v7 }
 0x1ab   : > { %4524 = vmatpush3.msra.mxu0 %v360_v39  ;;  %4535 = vmatpush3.msra.mxu1 %v364_v40 }
 0x1ac   : > { %4525 = vmatprep.subr.mxu0 %v4820_v7  ;;  %4536 = vmatprep.subr.mxu1 %v4820_v7 }
 0x1ad   : > { %4526 = vmatpush3.msra.mxu0 %v359_v41  ;;  %4527 = vmatprep.mubr.msk.f32.mxu0 %vm4821_vm1, %v4820_v7 }
 0x1ae   : > { %4537 = vmatpush3.msra.mxu1 %v363_v42  ;;  %4538 = vmatprep.mubr.msk.f32.mxu1 %vm4821_vm1, %v4820_v7 }
 0x1af   : > { %4528 = vmatmul.mubr.msk.f32.vlgmr.msra.gmra.mxu0 %vm248_vm0, %v4957_v24  ;;  %4539 = vmatmul.mubr.msk.f32.vlgmr.msra.gmra.mxu1 %vm248_vm0, %v4957_v24 }
 0x1b0   : > { %4541 = vmatprep.subr.mxu0 %v4820_v7  ;;  %4552 = vmatprep.subr.mxu1 %v4820_v7 }
 0x1b1   : > { %4542 = vmatpush3.msra.mxu0 %v370_v43  ;;  %4553 = vmatpush3.msra.mxu1 %v374_v44 }
 0x1b2   : > { %4543 = vmatprep.subr.mxu0 %v4820_v7  ;;  %4554 = vmatprep.subr.mxu1 %v4820_v7 }
 0x1b3   : > { %4544 = vmatpush3.msra.mxu0 %v369_v45  ;;  %4555 = vmatpush3.msra.mxu1 %v373_v46 }
 0x1b4   : > { %4545 = vmatprep.subr.mxu0 %v4820_v7  ;;  %4556 = vmatprep.subr.mxu1 %v4820_v7 }
 0x1b5   : > { %4546 = vmatpush3.msra.mxu0 %v368_v47  ;;  %4557 = vmatpush3.msra.mxu1 %v372_v48 }
 0x1b6   : > { %4547 = vmatprep.subr.mxu0 %v4820_v7  ;;  %4558 = vmatprep.subr.mxu1 %v4820_v7 }
 0x1b7   : > { %4548 = vmatpush3.msra.mxu0 %v367_v49  ;;  %4549 = vmatprep.mubr.msk.f32.mxu0 %vm4821_vm1, %v4820_v7 }
 0x1b8   : > { %4559 = vmatpush3.msra.mxu1 %v371_v50  ;;  %4560 = vmatprep.mubr.msk.f32.mxu1 %vm4821_vm1, %v4820_v7 }
 0x1b9   : > { %4550 = vmatmul.mubr.msk.f32.vlgmr.msra.gmra.mxu0 %vm248_vm0, %v4957_v24  ;;  %4561 = vmatmul.mubr.msk.f32.vlgmr.msra.gmra.mxu1 %vm248_vm0, %v4957_v24 }
 0x1ba   : > { %4563 = vmatprep.subr.mxu0 %v4820_v7  ;;  %4568 = vmatprep.subr.mxu1 %v4820_v7 }
 0x1bb   : > { %4565 = vmatprep.mubr.msk.f32.mxu0 %vm4821_vm1, %v4820_v7  ;;  %4570 = vmatprep.mubr.msk.f32.mxu1 %vm4821_vm1, %v4820_v7 }
 0x20c   : > { %v444_v51 = vpop.f32.mrf.mxu0  ;;  %v514_v52 = vpop.f32.mrf.mxu1 }
 0x20e   : > { %v4309_v53 = vpop.f32.mrf.mxu0  ;;  %v4320_v54 = vpop.f32.mrf.mxu1 }
 0x215   : > { %v584_v55 = vpop.f32.mrf.mxu0  ;;  %v654_v56 = vpop.f32.mrf.mxu1 }
 0x217   : > { %v4331_v57 = vpop.f32.mrf.mxu0  ;;  %v4342_v58 = vpop.f32.mrf.mxu1 }
 0x21f   : > { %v724_v59 = vpop.f32.mrf.mxu0  ;;  %v794_v24 = vpop.f32.mrf.mxu1 }
 0x221   : > { %v4353_v60 = vpop.f32.mrf.mxu0  ;;  %v4364_v61 = vpop.f32.mrf.mxu1 }
 0x229   : > { %v864_v62 = vpop.f32.mrf.mxu0  ;;  %v934_v63 = vpop.f32.mrf.mxu1 }
 0x22b   : > { %v4375_v0 = vpop.f32.mrf.mxu0  ;;  %v4386_v1 = vpop.f32.mrf.mxu1 }
 0x233   : > { %v1004_v2 = vpop.f32.mrf.mxu0  ;;  %v1074_v3 = vpop.f32.mrf.mxu1 }
 0x234   : > { %4564 = vmatpush3.xpose.msk.msra.mxu0 %vm2058_vm2, %v1004_v2  ;;  %4569 = vmatpush3.xpose.msk.msra.mxu1 %vm2058_vm2, %v1074_v3 }
 0x235   : > { %v4397_v4 = vpop.f32.mrf.mxu0  ;;  %v4408_v5 = vpop.f32.mrf.mxu1  ;;  %4573 = vmatprep.subr.mxu0 %v4820_v7  ;;  %4578 = vmatprep.subr.mxu1 %v4820_v7 }
 0x237   : > { %4566 = vmatmul.mubr.msk.f32.vlgmr.msra.gmra.mxu0 %vm2058_vm2, %v444_v51  ;;  %4571 = vmatmul.mubr.msk.f32.vlgmr.msra.gmra.mxu1 %vm2058_vm2, %v514_v52 }
 0x238   : > { %4575 = vmatprep.mubr.msk.f32.mxu0 %vm4821_vm1, %v4820_v7  ;;  %4580 = vmatprep.mubr.msk.f32.mxu1 %vm4821_vm1, %v4820_v7 }
 0x23d   : > { %v1144_v6 = vpop.f32.mrf.mxu0  ;;  %v1214_v8 = vpop.f32.mrf.mxu1 }
 0x23e   : > { %4574 = vmatpush3.xpose.msk.msra.mxu0 %vm2058_vm2, %v1144_v6  ;;  %4579 = vmatpush3.xpose.msk.msra.mxu1 %vm2058_vm2, %v1214_v8 }
 0x23f   : > { %v4419_v9 = vpop.f32.mrf.mxu0  ;;  %v4430_v10 = vpop.f32.mrf.mxu1  ;;  %4583 = vmatprep.subr.mxu0 %v4820_v7  ;;  %4588 = vmatprep.subr.mxu1 %v4820_v7 }
 0x241   : > { %4576 = vmatmul.mubr.msk.f32.vlgmr.msra.gmra.mxu0 %vm2058_vm2, %v584_v55  ;;  %4581 = vmatmul.mubr.msk.f32.vlgmr.msra.gmra.mxu1 %vm2058_vm2, %v654_v56 }
 0x242   : > { %4585 = vmatprep.mubr.msk.f32.mxu0 %vm4821_vm1, %v4820_v7  ;;  %4590 = vmatprep.mubr.msk.f32.mxu1 %vm4821_vm1, %v4820_v7 }
 0x247   : > { %v1284_v11 = vpop.f32.mrf.mxu0  ;;  %v1354_v12 = vpop.f32.mrf.mxu1 }
 0x248   : > { %4584 = vmatpush3.xpose.msk.msra.mxu0 %vm2058_vm2, %v1284_v11  ;;  %4589 = vmatpush3.xpose.msk.msra.mxu1 %vm2058_vm2, %v1354_v12 }
 0x249   : > { %v4441_v13 = vpop.f32.mrf.mxu0  ;;  %v4452_v14 = vpop.f32.mrf.mxu1  ;;  %4593 = vmatprep.subr.mxu0 %v4820_v7  ;;  %4598 = vmatprep.subr.mxu1 %v4820_v7 }
 0x24b   : > { %4586 = vmatmul.mubr.msk.f32.vlgmr.msra.gmra.mxu0 %vm2058_vm2, %v724_v59  ;;  %4591 = vmatmul.mubr.msk.f32.vlgmr.msra.gmra.mxu1 %vm2058_vm2, %v794_v24 }
 0x24c   : > { %4595 = vmatprep.mubr.msk.f32.mxu0 %vm4821_vm1, %v4820_v7  ;;  %4600 = vmatprep.mubr.msk.f32.mxu1 %vm4821_vm1, %v4820_v7 }
 0x251   : > { %v1424_v15 = vpop.f32.mrf.mxu0  ;;  %v1494_v16 = vpop.f32.mrf.mxu1 }
 0x252   : > { %4594 = vmatpush3.xpose.msk.msra.mxu0 %vm2058_vm2, %v1424_v15  ;;  %4599 = vmatpush3.xpose.msk.msra.mxu1 %vm2058_vm2, %v1494_v16 }
 0x253   : > { %v4463_v17 = vpop.f32.mrf.mxu0  ;;  %v4474_v18 = vpop.f32.mrf.mxu1  ;;  %4603 = vmatprep.subr.mxu0 %v4820_v7  ;;  %4608 = vmatprep.subr.mxu1 %v4820_v7 }
 0x255   : > { %4596 = vmatmul.mubr.msk.f32.vlgmr.msra.gmra.mxu0 %vm2058_vm2, %v864_v62  ;;  %4601 = vmatmul.mubr.msk.f32.vlgmr.msra.gmra.mxu1 %vm2058_vm2, %v934_v63 }
 0x256   : > { %4605 = vmatprep.mubr.msk.f32.mxu0 %vm4821_vm1, %v4820_v7  ;;  %4610 = vmatprep.mubr.msk.f32.mxu1 %vm4821_vm1, %v4820_v7 }
 0x25b   : > { %v1564_v19 = vpop.f32.mrf.mxu0  ;;  %v1634_v20 = vpop.f32.mrf.mxu1 }
 0x25c   : > { %4604 = vmatpush3.msra.mxu0 %v1564_v19  ;;  %4609 = vmatpush3.msra.mxu1 %v1634_v20 }
 0x25d   : > { %v4485_v21 = vpop.f32.mrf.mxu0  ;;  %v4496_v22 = vpop.f32.mrf.mxu1  ;;  %4613 = vmatprep.subr.mxu0 %v4820_v7  ;;  %4618 = vmatprep.subr.mxu1 %v4820_v7 }
 0x265   : > { %v5449_v23 = vpop.f32.mrf.mxu0  ;;  %v5451_v25 = vpop.f32.mrf.mxu1 }
 0x267   : > { %v4507_v26 = vpop.f32.mrf.mxu0  ;;  %v4518_v27 = vpop.f32.mrf.mxu1 }
 0x26f   : > { %v5453_v28 = vpop.f32.mrf.mxu0  ;;  %v5455_v29 = vpop.f32.mrf.mxu1 }
 0x271   : > { %v4529_v30 = vpop.f32.mrf.mxu0  ;;  %v4540_v31 = vpop.f32.mrf.mxu1 }
 0x279   : > { %v5457_v32 = vpop.f32.mrf.mxu0  ;;  %v5459_v33 = vpop.f32.mrf.mxu1 }
 0x27b   : > { %v4551_v34 = vpop.f32.mrf.mxu0  ;;  %v4562_v35 = vpop.f32.mrf.mxu1 }
 0x2f7   : > { %v2131_v36 = vpop.f32.mrf.mxu0  ;;  %v2207_v37 = vpop.f32.mrf.mxu1 }
 0x2f8   : > { %v2668_v38 = vsel %vm2667_vm3, %v2131_v36, -inf  ;;  %v2671_v41 = vsel %vm2667_vm3, %v2207_v37, -inf }
 0x2f9   : > { %v4572_v39 = vpop.f32.mrf.mxu1  ;;  %2669 = vmax.xlane.f32.xlu1 %v2668_v38  ;;  %v4567_v40 = vpop.f32.mrf.mxu0 }
 0x2fd   : > { %2672 = vmax.xlane.f32.xlu1 %v2671_v41 }
 0x301   : > { %v2283_v42 = vpop.f32.mrf.mxu0  ;;  %v2359_v43 = vpop.f32.mrf.mxu1 }
 0x302   : > { %v2677_v44 = vsel %vm2667_vm3, %v2359_v43, -inf  ;;  %v2674_v45 = vsel %vm2667_vm3, %v2283_v42, -inf }
 0x303   : > { %v4582_v46 = vpop.f32.mrf.mxu1  ;;  %2678 = vmax.xlane.f32.xlu1 %v2677_v44  ;;  %2675 = vmax.xlane.f32.xlu0 %v2674_v45  ;;  %v4577_v47 = vpop.f32.mrf.mxu0 }
 0x30b   : > { %v2435_v48 = vpop.f32.mrf.mxu0  ;;  %v2511_v49 = vpop.f32.mrf.mxu1 }
 0x30c   : > { %v2683_v50 = vsel %vm2667_vm3, %v2511_v49, -inf  ;;  %v2680_v51 = vsel %vm2667_vm3, %v2435_v48, -inf }
 0x30d   : > { %v4592_v52 = vpop.f32.mrf.mxu1  ;;  %2684 = vmax.xlane.f32.xlu1 %v2683_v50  ;;  %2681 = vmax.xlane.f32.xlu0 %v2680_v51  ;;  %v4587_v53 = vpop.f32.mrf.mxu0 }
 0x315   : > { %v2587_v54 = vpop.f32.mrf.mxu0  ;;  %v2663_v55 = vpop.f32.mrf.mxu1 }
 0x316   : > { %v2689_v56 = vsel %vm2667_vm3, %v2663_v55, -inf  ;;  %v2686_v57 = vsel %vm2667_vm3, %v2587_v54, -inf }
 0x317   : > { %v4602_v58 = vpop.f32.mrf.mxu1  ;;  %2690 = vmax.xlane.f32.xlu1 %v2689_v56  ;;  %2687 = vmax.xlane.f32.xlu0 %v2686_v57  ;;  %v4597_v59 = vpop.f32.mrf.mxu0 }
 0x382   : > { %v2670_v24 = vpop.xlane.xlu1 %2669 }
 0x383   : > { %v2692_v60 = vsub.f32 %v2131_v36, %v2670_v24 }
 0x385   : > { %v2700_v61 = vmul.f32 1.442695, %v2692_v60 }
 0x386   : > { %v2673_v62 = vpop.xlane.xlu1 %2672 }
 0x387   : > { %4726 = vpow2.f32 %v2700_v61  ;;  %v2693_v63 = vsub.f32 %v2207_v37, %v2673_v62  ;;  %v3342_v62 = vld [vmem:[%s5621_s4 + $0x8] sm:$0xf] }
 0x389   : > { %v2702_v0 = vmul.f32 1.442695, %v2693_v63 }
 0x38b   : > { %4728 = vpow2.f32 %v2702_v0 }
 0x38c   : > { %v2679_v1 = vpop.xlane.xlu1 %2678  ;;  %v2676_v2 = vpop.xlane.xlu0 %2675 }
 0x38d   : > { %v2695_v3 = vsub.f32 %v2359_v43, %v2679_v1  ;;  %v2694_v4 = vsub.f32 %v2283_v42, %v2676_v2  ;;  %v3343_v1 = vld [vmem:[%s5621_s4 + $0xc] sm:$0xf] }
 0x38f   : > { %v2706_v5 = vmul.f32 1.442695, %v2695_v3  ;;  %v2704_v6 = vmul.f32 1.442695, %v2694_v4  ;;  %v3345_v4 = vld [vmem:[%s5621_s4 + $0x14] sm:$0xf] }
 0x391   : > { %4730 = vpow2.f32 %v2706_v5 }
 0x392   : > { %4732 = vpow2.f32 %v2704_v6  ;;  %v3344_v6 = vld [vmem:[%s5621_s4 + $0x10] sm:$0xf] }
 0x394   : > { %v4727_v8 = vpop.eup %4726 }
 0x395   : > { %v2716_v9 = vsel %vm2667_vm3, %v4727_v8, 0.0 }
 0x396   : > { %v2685_v10 = vpop.xlane.xlu1 %2684  ;;  %v2682_v11 = vpop.xlane.xlu0 %2681  ;;  %2717 = vadd.xlane.f32.xlu0 %v2716_v9 }
 0x397   : > { %v2697_v12 = vsub.f32 %v2511_v49, %v2685_v10  ;;  %v2696_v13 = vsub.f32 %v2435_v48, %v2682_v11  ;;  %v3347_v11 = vld [vmem:[%s5621_s4 + $0x1c] sm:$0xf] }
 0x398   : > { %v4729_v14 = vpop.eup %4728 }
 0x399   : > { %v2710_v15 = vmul.f32 1.442695, %v2697_v12  ;;  %v2708_v16 = vmul.f32 1.442695, %v2696_v13  ;;  %v2719_v17 = vsel %vm2667_vm3, %v4729_v14, 0.0 }
 0x39a   : > { %2720 = vadd.xlane.f32.xlu1 %v2719_v17  ;;  %v3346_v13 = vld [vmem:[%s5621_s4 + $0x18] sm:$0xf] }
 0x39b   : > { %4734 = vpow2.f32 %v2710_v15 }
 0x39c   : > { %4736 = vpow2.f32 %v2708_v16 }
 0x39e   : > { %v4731_v18 = vpop.eup %4730 }
 0x39f   : > { %v4733_v19 = vpop.eup %4732  ;;  %v2725_v20 = vsel %vm2667_vm3, %v4731_v18, 0.0 }
 0x3a0   : > { %v2691_v21 = vpop.xlane.xlu1 %2690  ;;  %v2688_v22 = vpop.xlane.xlu0 %2687  ;;  %2726 = vadd.xlane.f32.xlu1 %v2725_v20  ;;  %v2722_v26 = vsel %vm2667_vm3, %v4733_v19, 0.0 }
 0x3a1   : > { %v2699_v27 = vsub.f32 %v2663_v55, %v2691_v21  ;;  %v2698_v30 = vsub.f32 %v2587_v54, %v2688_v22  ;;  %2723 = vadd.xlane.f32.xlu0 %v2722_v26 }
 0x3a3   : > { %v2714_v31 = vmul.f32 1.442695, %v2699_v27  ;;  %v2712_v34 = vmul.f32 1.442695, %v2698_v30 }
 0x3a5   : > { %4738 = vpow2.f32 %v2714_v31 }
 0x3a6   : > { %4740 = vpow2.f32 %v2712_v34 }
 0x3a8   : > { %v4735_v35 = vpop.eup %4734 }
 0x3a9   : > { %v4737_v36 = vpop.eup %4736  ;;  %v2731_v37 = vsel %vm2667_vm3, %v4735_v35, 0.0 }
 0x3aa   : > { %2732 = vadd.xlane.f32.xlu1 %v2731_v37  ;;  %v2728_v38 = vsel %vm2667_vm3, %v4737_v36, 0.0 }
 0x3ab   : > { %2729 = vadd.xlane.f32.xlu0 %v2728_v38 }
 0x3b2   : > { %v4739_v39 = vpop.eup %4738 }
 0x3b3   : > { %v4741_v40 = vpop.eup %4740  ;;  %v2737_v41 = vsel %vm2667_vm3, %v4739_v39, 0.0 }
 0x3b4   : > { %2738 = vadd.xlane.f32.xlu1 %v2737_v41  ;;  %v2734_v42 = vsel %vm2667_vm3, %v4741_v40, 0.0 }
 0x3b5   : > { %2735 = vadd.xlane.f32.xlu0 %v2734_v42 }
 0x41f   : > { %v2718_v43 = vpop.xlane.xlu0 %2717 }
 0x420   : > { %4742 = vrcp.f32 %v2718_v43 }
 0x423   : > { %v2721_v44 = vpop.xlane.xlu1 %2720 }
 0x424   : > { %4744 = vrcp.f32 %v2721_v44 }
 0x429   : > { %v2727_v45 = vpop.xlane.xlu1 %2726 }
 0x42a   : > { %4746 = vrcp.f32 %v2727_v45  ;;  %v2724_v46 = vpop.xlane.xlu0 %2723 }
 0x42b   : > { %4748 = vrcp.f32 %v2724_v46 }
 0x42d   : > { %v4743_v47 = vpop.eup %4742 }
 0x42e   : > { %v2748_v48 = vmul.f32 %v4743_v47, %v4727_v8 }
 0x430   : > { %4606 = vmatmul.mubr.msk.f32.vlgmr.msra.gmra.mxu0 %vm2667_vm3, %v2748_v48 }
 0x431   : > { %v4745_v49 = vpop.eup %4744  ;;  %4614 = vmatpush3.msra.mxu0 %v5449_v23  ;;  %4615 = vmatprep.mubr.msk.f32.mxu0 %vm4821_vm1, %v4820_v7 }
 0x432   : > { %v2749_v50 = vmul.f32 %v4745_v49, %v4729_v14  ;;  %4623 = vmatprep.subr.mxu0 %v4820_v7 }
 0x433   : > { %v2733_v51 = vpop.xlane.xlu1 %2732 }
 0x434   : > { %4750 = vrcp.f32 %v2733_v51  ;;  %v2730_v52 = vpop.xlane.xlu0 %2729  ;;  %4611 = vmatmul.mubr.msk.f32.vlgmr.msra.gmra.mxu1 %vm2667_vm3, %v2749_v50 }
 0x435   : > { %4752 = vrcp.f32 %v2730_v52  ;;  %4619 = vmatpush3.msra.mxu1 %v5451_v25  ;;  %4620 = vmatprep.mubr.msk.f32.mxu1 %vm4821_vm1, %v4820_v7 }
 0x436   : > { %4628 = vmatprep.subr.mxu1 %v4820_v7 }
 0x437   : > { %v4747_v23 = vpop.eup %4746 }
 0x438   : > { %v4749_v53 = vpop.eup %4748  ;;  %v2751_v54 = vmul.f32 %v4747_v23, %v4731_v18 }
 0x439   : > { %v2750_v55 = vmul.f32 %v4749_v53, %v4733_v19 }
 0x43a   : > { %4621 = vmatmul.mubr.msk.f32.vlgmr.msra.gmra.mxu1 %vm2667_vm3, %v2751_v54 }
 0x43b   : > { %4616 = vmatmul.mubr.msk.f32.vlgmr.msra.gmra.mxu0 %vm2667_vm3, %v2750_v55  ;;  %4629 = vmatpush3.msra.mxu1 %v5455_v29 }
 0x43c   : > { %4624 = vmatpush3.msra.mxu0 %v5453_v28  ;;  %4625 = vmatprep.mubr.msk.f32.mxu0 %vm4821_vm1, %v4820_v7 }
 0x43d   : > { %v2739_v25 = vpop.xlane.xlu1 %2738  ;;  %4630 = vmatprep.mubr.msk.f32.mxu1 %vm4821_vm1, %v4820_v7  ;;  %4633 = vmatprep.subr.mxu0 %v4820_v7 }
 0x43e   : > { %4754 = vrcp.f32 %v2739_v25  ;;  %v2736_v56 = vpop.xlane.xlu0 %2735  ;;  %4638 = vmatprep.subr.mxu1 %v4820_v7  ;;  %v4126_v25 = vld [vmem:[%s5622_s5] ss:$0 sm:$0xff] }
 0x43f   : > { %4756 = vrcp.f32 %v2736_v56 }
 0x441   : > { %v4751_v57 = vpop.eup %4750 }
 0x442   : > { %v4753_v58 = vpop.eup %4752  ;;  %v2753_v59 = vmul.f32 %v4751_v57, %v4735_v35 }
 0x443   : > { %v2752_v29 = vmul.f32 %v4753_v58, %v4737_v36 }
 0x444   : > { %4631 = vmatmul.mubr.msk.f32.vlgmr.msra.gmra.mxu1 %vm2667_vm3, %v2753_v59 }
 0x445   : > { %4626 = vmatmul.mubr.msk.f32.vlgmr.msra.gmra.mxu0 %vm2667_vm3, %v2752_v29  ;;  %4639 = vmatpush3.msra.mxu1 %v5459_v33  ;;  %v3341_v33 = vld [vmem:[%s5621_s4 + $0x4] sm:$0xf] }
 0x446   : > { %4634 = vmatpush3.msra.mxu0 %v5457_v32  ;;  %4635 = vmatprep.mubr.msk.f32.mxu0 %vm4821_vm1, %v4820_v7  ;;  %v3340_v32 = vld [vmem:[%s5621_s4] sm:$0xf] }
 0x447   : > { %4640 = vmatprep.mubr.msk.f32.mxu1 %vm4821_vm1, %v4820_v7  ;;  %4643 = vmatprep.subr.mxu0 %v4820_v7 }
 0x448   : > { %4648 = vmatprep.subr.mxu1 %v4820_v7 }
 0x44b   : > { %v4755_v28 = vpop.eup %4754 }
 0x44c   : > { %v4757_v24 = vpop.eup %4756  ;;  %v2755_v60 = vmul.f32 %v4755_v28, %v4739_v39 }
 0x44d   : > { %v2754_v61 = vmul.f32 %v4757_v24, %v4741_v40 }
 0x44e   : > { %4641 = vmatmul.mubr.msk.f32.vlgmr.msra.gmra.mxu1 %vm2667_vm3, %v2755_v60 }
 0x44f   : > { %4636 = vmatmul.mubr.msk.f32.vlgmr.msra.gmra.mxu0 %vm2667_vm3, %v2754_v61  ;;  %4650 = vmatprep.mubr.msk.f32.mxu1 %vm4821_vm1, %v4820_v7 }
 0x450   : > { %4645 = vmatprep.mubr.msk.f32.mxu0 %vm4821_vm1, %v4820_v7  ;;  %4644 = vmatpush3.msk.msra.mxu0 %vm3351_vm4, %v3340_v32 }
 0x451   : > { %4653 = vmatprep.subr.mxu0 %v4820_v7  ;;  %4649 = vmatpush3.msk.msra.mxu1 %vm3351_vm4, %v3341_v33 }
 0x452   : > { %4658 = vmatprep.subr.mxu1 %v4820_v7 }
 0x4f0   : > { %v2825_v63 = vpop.f32.mrf.mxu0 }
 0x4f1   : > { %4646 = vmatmul.mubr.msk.f32.vlgmr.msra.gmra.mxu0 %vm2058_vm2, %v2825_v63 }
 0x4f2   : > { %v4607_v0 = vpop.f32.mrf.mxu0  ;;  %4654 = vmatpush3.msk.msra.mxu0 %vm3351_vm4, %v3342_v62  ;;  %4655 = vmatprep.mubr.msk.f32.mxu0 %vm4821_vm1, %v4820_v7 }
 0x4f3   : > { %4663 = vmatprep.subr.mxu0 %v4820_v7 }
 0x4f4   : > { %v2898_v2 = vpop.f32.mrf.mxu1 }
 0x4f5   : > { %4651 = vmatmul.mubr.msk.f32.vlgmr.msra.gmra.mxu1 %vm2058_vm2, %v2898_v2 }
 0x4f6   : > { %v4612_v3 = vpop.f32.mrf.mxu1  ;;  %4659 = vmatpush3.msk.msra.mxu1 %vm3351_vm4, %v3343_v1  ;;  %4660 = vmatprep.mubr.msk.f32.mxu1 %vm4821_vm1, %v4820_v7 }
 0x4f7   : > { %4668 = vmatprep.subr.mxu1 %v4820_v7 }
 0x4fa   : > { %v3044_v5 = vpop.f32.mrf.mxu1 }
 0x4fb   : > { %v2971_v8 = vpop.f32.mrf.mxu0  ;;  %4661 = vmatmul.mubr.msk.f32.vlgmr.msra.gmra.mxu1 %vm2058_vm2, %v3044_v5 }
 0x4fc   : > { %4656 = vmatmul.mubr.msk.f32.vlgmr.msra.gmra.mxu0 %vm2058_vm2, %v2971_v8  ;;  %v4622_v9 = vpop.f32.mrf.mxu1  ;;  %4669 = vmatpush3.msk.msra.mxu1 %vm3351_vm4, %v3345_v4 }
 0x4fd   : > { %v4617_v10 = vpop.f32.mrf.mxu0  ;;  %4664 = vmatpush3.msk.msra.mxu0 %vm3351_vm4, %v3344_v6  ;;  %4665 = vmatprep.mubr.msk.f32.mxu0 %vm4821_vm1, %v4820_v7 }
 0x4fe   : > { %4670 = vmatprep.mubr.msk.f32.mxu1 %vm4821_vm1, %v4820_v7  ;;  %4673 = vmatprep.subr.mxu0 %v4820_v7 }
 0x4ff   : > { %4678 = vmatprep.subr.mxu1 %v4820_v7 }
 0x504   : > { %v3190_v12 = vpop.f32.mrf.mxu1 }
 0x505   : > { %v3117_v14 = vpop.f32.mrf.mxu0  ;;  %4671 = vmatmul.mubr.msk.f32.vlgmr.msra.gmra.mxu1 %vm2058_vm2, %v3190_v12 }
 0x506   : > { %4666 = vmatmul.mubr.msk.f32.vlgmr.msra.gmra.mxu0 %vm2058_vm2, %v3117_v14  ;;  %v4632_v15 = vpop.f32.mrf.mxu1  ;;  %4679 = vmatpush3.msk.msra.mxu1 %vm3351_vm4, %v3347_v11 }
 0x507   : > { %v4627_v16 = vpop.f32.mrf.mxu0  ;;  %4674 = vmatpush3.msk.msra.mxu0 %vm3351_vm4, %v3346_v13  ;;  %4675 = vmatprep.mubr.msk.f32.mxu0 %vm4821_vm1, %v4820_v7 }
 0x508   : > { %4680 = vmatprep.mubr.msk.f32.mxu1 %vm4821_vm1, %v4820_v7 }
 0x50e   : > { %v3336_v17 = vpop.f32.mrf.mxu1 }
 0x50f   : > { %v3263_v18 = vpop.f32.mrf.mxu0  ;;  %4681 = vmatmul.mubr.msk.f32.vlgmr.msra.gmra.mxu1 %vm2058_vm2, %v3336_v17 }
 0x510   : > { %4676 = vmatmul.mubr.msk.f32.vlgmr.msra.gmra.mxu0 %vm2058_vm2, %v3263_v18  ;;  %v4642_v19 = vpop.f32.mrf.mxu1 }
 0x511   : > { %v4637_v20 = vpop.f32.mrf.mxu0 }
 0x5b1   : > { %v3421_v21 = vpop.f32.mrf.mxu0 }
 0x5b2   : > { %v3957_v7 = vsel %vm248_vm0, %v3421_v21, 0.0 }
 0x5b3   : > { %v4647_v22 = vpop.f32.mrf.mxu0 }
 0x5b5   : > { %v3497_v26 = vpop.f32.mrf.mxu1 }
 0x5b6   : > { %v3958_v36 = vsel %vm248_vm0, %v3497_v26, 0.0 }
 0x5b7   : > { %v4652_v27 = vpop.f32.mrf.mxu1  ;;  %v3959_v38 = vadd.f32 %v3958_v36, %v3957_v7 }
 0x5bb   : > { %v3649_v30 = vpop.f32.mrf.mxu1 }
 0x5bc   : > { %v3573_v31 = vpop.f32.mrf.mxu0  ;;  %v3962_v44 = vsel %vm248_vm0, %v3649_v30, 0.0 }
 0x5bd   : > { %v4662_v34 = vpop.f32.mrf.mxu1  ;;  %v3960_v37 = vsel %vm248_vm0, %v3573_v31, 0.0 }
 0x5be   : > { %v4657_v35 = vpop.f32.mrf.mxu0  ;;  %v3961_v40 = vadd.f32 %v3960_v37, %v3959_v38 }
 0x5c0   : > { %v3963_v46 = vadd.f32 %v3962_v44, %v3961_v40 }
 0x5c5   : > { %v3801_v39 = vpop.f32.mrf.mxu1 }
 0x5c6   : > { %v3725_v41 = vpop.f32.mrf.mxu0  ;;  %v3966_v48 = vsel %vm248_vm0, %v3801_v39, 0.0 }
 0x5c7   : > { %v4672_v42 = vpop.f32.mrf.mxu1  ;;  %v3964_v45 = vsel %vm248_vm0, %v3725_v41, 0.0 }
 0x5c8   : > { %v4667_v43 = vpop.f32.mrf.mxu0  ;;  %v3965_v47 = vadd.f32 %v3964_v45, %v3963_v46 }
 0x5ca   : > { %v3967_v50 = vadd.f32 %v3966_v48, %v3965_v47 }
 0x5cf   : > { %v3953_v49 = vpop.f32.mrf.mxu1 }
 0x5d0   : > { %v3877_v51 = vpop.f32.mrf.mxu0  ;;  %v3970_v55 = vsel %vm248_vm0, %v3953_v49, 0.0 }
 0x5d1   : > { %v3968_v52 = vsel %vm248_vm0, %v3877_v51, 0.0  ;;  %v4682_v23 = vpop.f32.mrf.mxu1 }
 0x5d2   : > { %v3969_v53 = vadd.f32 %v3968_v52, %v3967_v50  ;;  %v4677_v54 = vpop.f32.mrf.mxu0 }
 0x5d4   : > { %v3971_v56 = vadd.f32 %v3970_v55, %v3969_v53 }
 0x5d6   : > { %v3979_v57 = vadd.f32 %v4126_v25, %v3971_v56 }
 0x5d8   : > { %3980 = vst.msk [vmem:[%s242_s26] sm:$0xff] %vm248_vm0, %v3979_v57 }
 0x5d9   : > { %4771 = shalt.err (!%p4768_p3)
}
 0x5da   : > { %s4772_s15 = scalar_lea.hbm %s3993_s10, 128  ;;  %s4776_s18 = scalar_lea.hbm %s5623_s6, 256 }
 0x5db   : > { %p4773_p4 = scmp.ne.s32.totalorder %s3993_s10, %s4772_s15  ;;  %p4777_p9 = scmp.lt.s32.totalorder %s3993_s10, %s5623_s6 }
 0x5dc   : > { %p4778_p10 = scmp.lt.s32.totalorder %s4776_s18, %s4772_s15 }
 0x5dd   : > { %p4774_p7 = pnand %p4773_p4, %p4896_p5 }
 0x5de   : > { %p4779_p11 = por %p4778_p10, %p4777_p9 }
 0x5df   : > { %p4775_p8 = pneg %p4774_p7 }
 0x5e1   : > { %p4780_p12 = pnand %p4779_p11, %p4775_p8 }
 0x5e3   : > { %4783 = shalt.err (!%p4780_p12)
}
 0x5e4   : > { %4683 = dma.vmem_to_hbm [thread:$0]  (%p4896_p5), %s3996_s28, 128, %s3993_s10, %s3982_s11  }
 0x5e5 PF: > { %p4689_p13 = scmp.ge.s32.totalorder %s4818_s24, 2  ;;  %s4007_s26 = sand.u32 1, %s4806_s21  }
 0x5e6   : > { %s4008_s29 = scalar_lea.sflag [#allocation3], %s4007_s26 }
 0x5e7   : > { %p4686_p0 = pnand %p4689_p13, %p4900_p6 }
 0x5e9   : > { %p4687_p1 = pneg %p4686_p0 }
 0x5eb   : > { %4801 = dma.done.wait (%p4687_p1), %s4008_s29, 128  }
 0x5ec   : > { %4803 = vsyncadd (%p4687_p1), %s4008_s29, 4294967168  ;;  %p16_p2 = scmp.ge.s32.totalorder %s4883_s27, 4   ;;  %s5626_s21 = smov %s4810_s22 }
 0x5ed   : > { %s5627_s22 = smov %s4814_s23  ;;  %s5628_s23 = smov %s4894_s30 }
 0x5ee   : > { %s5629_s24 = smov %s4883_s27  ;;  %18 = sbr.rel (!%p16_p2) target bundleno = 3 (0x3), region = 79 }
 0x5f3   :  { %4013 = vsyncpa [#allocation3], 1 }
 0x5f4   :  { %4015 = vsyncpa [#allocation3 + $0x1], 1 }

</bundles_post_ra>
